<compile_context>
chip_gen: v7x
topology: tpu7x:2x2x1
jax: 0.10.0
libtpu: 0.0.40
codegen_flags: <defaults>
</compile_context>

<pallas_src>
import itertools
import numpy as np

import jax
import jax.numpy as jnp
from jax.experimental import pallas as pl
from jax.experimental.pallas import tpu as pltpu

# ---- module "parameters" (KnowledgeDistillationLoss.__init__ defaults) ----
ALPHA = 0.5
BETA = 0.5
GAMMA = 0.1          # unused in forward (kept for parity with __init__)
DELTA = 0.1          # unused in forward
TEMPERATURE = 1.0
IOU_THRESHOLD = 0.5

_LANE = 128
_OUT_SUB, _OUT_LANE = 8, 128     # lane/sublane-dense output slab per image


def _pad_lanes(n):
    return ((n + _LANE - 1) // _LANE) * _LANE


# --------------------------------------------------------------------------
# Kernel 1: batched pairwise IoU (torchvision box_iou semantics), grid=(1,)
#   s_ref: (B, Ns, 4)      student coords, detections on sublanes
#   t_ref: (B, 4, Ntp)     teacher coords, detections on lanes (padded to 128k)
#   iou_ref: (B, Ns, Ntp)  lane-dense output slab
# --------------------------------------------------------------------------
def _iou_kernel(s_ref, t_ref, iou_ref):
    s = s_ref[...]                                   # (B, Ns, 4)
    t = t_ref[...]                                   # (B, 4, Ntp)

    sx1, sy1 = s[:, :, 0:1], s[:, :, 1:2]            # (B, Ns, 1) columns
    sx2, sy2 = s[:, :, 2:3], s[:, :, 3:4]
    tx1, ty1 = t[:, 0:1, :], t[:, 1:2, :]            # (B, 1, Ntp) rows
    tx2, ty2 = t[:, 2:3, :], t[:, 3:4, :]

    area_s = (sx2 - sx1) * (sy2 - sy1)               # (B, Ns, 1)
    area_t = (tx2 - tx1) * (ty2 - ty1)               # (B, 1, Ntp)

    w = jnp.maximum(jnp.minimum(sx2, tx2) - jnp.maximum(sx1, tx1), 0.0)
    h = jnp.maximum(jnp.minimum(sy2, ty2) - jnp.maximum(sy1, ty1), 0.0)
    inter = w * h                                    # (B, Ns, Ntp)
    union = area_s + area_t - inter
    # Exact division (no eps, no approx reciprocal): matches torchvision.box_iou so
    # the >0.5 threshold / Hungarian cost cannot flip on borderline pairs.  Padded
    # teacher lanes give inter=0, union=area_s -> iou=0 and are sliced off anyway.
    iou_ref[...] = inter / union


@jax.jit
def compute_iou_batched(student_boxes, teacher_boxes):
    """student_boxes: (B, Ns, 4), teacher_boxes: (B, Nt, 4) -> IoU (B, Ns, Nt)."""
    B, Ns, _ = student_boxes.shape
    Nt = teacher_boxes.shape[1]
    Ntp = _pad_lanes(Nt)

    sb = student_boxes.astype(jnp.float32)                            # (B, Ns, 4)
    tb = jnp.swapaxes(teacher_boxes.astype(jnp.float32), 1, 2)        # (B, 4, Nt)
    tb = jnp.pad(tb, ((0, 0), (0, 0), (0, Ntp - Nt)))                 # (B, 4, Ntp)

    # TODO(synk): for realistic detection counts (Ns, Nt in the hundreds/thousands),
    # tile the output along Nt with a second grid axis (lane tile >=512, multiple of
    # 128) and set vmem_limit_bytes — required on v7x's 64 MiB VMEM.
    iou_pad = pl.pallas_call(
        _iou_kernel,
        out_shape=jax.ShapeDtypeStruct((B, Ns, Ntp), jnp.float32),
        grid=(1,),
        in_specs=[
            pl.BlockSpec((B, Ns, 4), lambda i: (0, 0, 0)),
            pl.BlockSpec((B, 4, Ntp), lambda i: (0, 0, 0)),
        ],
        out_specs=pl.BlockSpec((B, Ns, Ntp), lambda i: (0, 0, 0)),
        compiler_params=pltpu.CompilerParams(dimension_semantics=("arbitrary",)),
    )(sb, tb)
    return iou_pad[:, :, :Nt]


# --------------------------------------------------------------------------
# Kernel 2: fused whole-batch KD loss over matched pairs, grid=(1,)
#   s_cat/t_cat: (B, N, C+4)   class logits concatenated with box coords
#   sel_s/sel_t: (B, Mp, N)    one-hot row-selection matrices (zero row = unmatched)
#   out: (B, 8, 128) lane-dense slab; per-image total lives in out[b, 0, 0]
# --------------------------------------------------------------------------
def _kd_loss_kernel(s_cat_ref, t_cat_ref, sel_s_ref, sel_t_ref, out_ref):
    sel_s = sel_s_ref[...]                              # (B, Mp, N)
    sel_t = sel_t_ref[...]

    # In-kernel gather of matched rows (exact: one-hot weights, HIGHEST precision)
    hi = jax.lax.Precision.HIGHEST
    s_all = jnp.einsum('bmn,bnc->bmc', sel_s, s_cat_ref[...],
                       preferred_element_type=jnp.float32, precision=hi)
    t_all = jnp.einsum('bmn,bnc->bmc', sel_t, t_cat_ref[...],
                       preferred_element_type=jnp.float32, precision=hi)
    C = s_all.shape[-1] - 4
    s = s_all[:, :, :C]                                 # (B, Mp, C) matched logits
    t = t_all[:, :, :C]
    sbx = s_all[:, :, C:]                               # (B, Mp, 4) matched boxes
    tbx = t_all[:, :, C:]
    # match mask derived from the one-hot rows (1.0 matched / 0.0 padded slot);
    # padded slots gather all-zero rows, so no NaN can leak into the masked sums.
    mask = jnp.sum(sel_s, axis=-1, keepdims=True)       # (B, Mp, 1)

    inv_t = 1.0 / TEMPERATURE
    s = s * inv_t
    t = t * inv_t

    # student log-softmax over the class (lane) dim
    s_shift = s - jnp.max(s, axis=-1, keepdims=True)
    log_ps = s_shift - jnp.log(jnp.sum(jnp.exp(s_shift), axis=-1, keepdims=True))

    # teacher softmax (+ log); exact divide for parity with F.softmax/F.kl_div
    t_shift = t - jnp.max(t, axis=-1, keepdims=True)
    t_exp = jnp.exp(t_shift)
    t_sum = jnp.sum(t_exp, axis=-1, keepdims=True)
    log_pt = t_shift - jnp.log(t_sum)
    p_t = t_exp / t_sum

    # F.kl_div(log_ps, p_t, reduction='batchmean') on a (C,) vector == sum_c / C
    kl_row = jnp.sum(p_t * (log_pt - log_ps), axis=-1, keepdims=True)   # (B, Mp, 1)
    class_sum = jnp.sum(kl_row * mask, axis=1, keepdims=True)           # (B, 1, 1)

    # F.smooth_l1_loss(student_box, teacher_box, reduction='mean') == sum/4 per match
    d = sbx - tbx
    ad = jnp.abs(d)
    sl1 = jnp.where(ad < 1.0, 0.5 * d * d, ad - 0.5)
    sl1_row = jnp.sum(sl1, axis=-1, keepdims=True)                      # (B, Mp, 1)
    bbox_sum = jnp.sum(sl1_row * mask, axis=1, keepdims=True)           # (B, 1, 1)

    num = jnp.sum(mask, axis=1, keepdims=True)                          # (B, 1, 1)
    denom = jnp.maximum(num, 1.0)
    class_loss = class_sum * (TEMPERATURE ** 2) / (jnp.float32(C) * denom)
    bbox_loss = bbox_sum / (4.0 * denom)
    total = jnp.where(num > 0.0, ALPHA * class_loss + BETA * bbox_loss, 0.0)

    # lane/sublane-dense writeback (full unmasked vst, no partial-store path)
    out_ref[...] = jnp.broadcast_to(total, out_ref.shape).astype(out_ref.dtype)


@jax.jit
def kd_loss_batched(s_scores, t_scores, s_boxes, t_boxes, sel_s, sel_t):
    """One fused pallas_call for the whole batch; returns per-image totals (B,)."""
    B, N, C = s_scores.shape
    Mp = sel_s.shape[1]
    s_cat = jnp.concatenate([s_scores.astype(jnp.float32),
                             s_boxes.astype(jnp.float32)], axis=-1)     # (B, N, C+4)
    t_cat = jnp.concatenate([t_scores.astype(jnp.float32),
                             t_boxes.astype(jnp.float32)], axis=-1)

    out = pl.pallas_call(
        _kd_loss_kernel,
        out_shape=jax.ShapeDtypeStruct((B, _OUT_SUB, _OUT_LANE), jnp.float32),
        grid=(1,),
        in_specs=[
            pl.BlockSpec((B, N, C + 4), lambda i: (0, 0, 0)),
            pl.BlockSpec((B, N, C + 4), lambda i: (0, 0, 0)),
            pl.BlockSpec((B, Mp, N), lambda i: (0, 0, 0)),
            pl.BlockSpec((B, Mp, N), lambda i: (0, 0, 0)),
        ],
        out_specs=pl.BlockSpec((B, _OUT_SUB, _OUT_LANE), lambda i: (0, 0, 0)),
        compiler_params=pltpu.CompilerParams(dimension_semantics=("arbitrary",)),
    )(s_cat, t_cat, sel_s, sel_t)
    return out[:, 0, 0]


# --------------------------------------------------------------------------
# Host-side glue: exact Hungarian assignment (brute force, small square case)
# --------------------------------------------------------------------------
# TODO(synk): scipy.optimize.linear_sum_assignment has no Pallas equivalent
# (combinatorial, host-side even in the reference).  Exact brute force is O(N!);
# fine for N<=8, replace with a real O(N^3) Hungarian for larger N.
def _linear_sum_assignment_square(cost):
    n = cost.shape[0]
    assert cost.shape[0] == cost.shape[1], "brute-force matcher assumes square cost"
    perms = np.array(list(itertools.permutations(range(n))), dtype=np.int64)
    costs = cost[np.arange(n)[None, :], perms].sum(axis=1)
    best = perms[int(np.argmin(costs))]
    return np.arange(n), best


def knowledge_distillation_loss(student_outputs, teacher_outputs):
    """Reproduces KnowledgeDistillationLoss.forward.

    Note: faithful to the reference, per-image losses are NOT accumulated over the
    batch loop — only the last image's class/bbox loss reaches total_loss.  If that
    behavior is confirmed as intended, slicing everything to the last image before
    the IoU kernel / matcher / loss kernel is a valid B-fold reduction; we keep the
    full-batch (single fused block) path here so per-image losses remain available.
    """
    B = len(student_outputs)
    s_boxes_all = jnp.stack([o['boxes'] for o in student_outputs]).astype(jnp.float32)
    t_boxes_all = jnp.stack([o['boxes'] for o in teacher_outputs]).astype(jnp.float32)
    s_scores_all = jnp.stack([o['scores'] for o in student_outputs]).astype(jnp.float32)
    t_scores_all = jnp.stack([o['scores'] for o in teacher_outputs]).astype(jnp.float32)
    N = s_boxes_all.shape[1]

    # --- one batched IoU kernel + a SINGLE device->host sync for the matcher ---
    iou_all = np.asarray(compute_iou_batched(s_boxes_all, t_boxes_all))   # (B, N, N)

    # --- Hungarian assignment per image (host) -> one-hot selection matrices ---
    # (zero rows == unmatched slots; the mask is recovered in-kernel from row sums)
    Mp = N
    sel_s = np.zeros((B, Mp, N), np.float32)
    sel_t = np.zeros((B, Mp, N), np.float32)
    for b in range(B):
        rows, cols = _linear_sum_assignment_square(-iou_all[b])
        k = 0
        for si, ti in zip(rows, cols):
            if iou_all[b, si, ti] > IOU_THRESHOLD:
                sel_s[b, k, si] = 1.0
                sel_t[b, k, ti] = 1.0
                k += 1

    # --- one fused batched KD-loss kernel (matched rows gathered in-kernel) ---
    per_image = kd_loss_batched(s_scores_all, t_scores_all,
                                s_boxes_all, t_boxes_all,
                                jnp.asarray(sel_s), jnp.asarray(sel_t))
    # reference semantics: only the last image's class/bbox loss reaches total_loss
    return per_image[B - 1]


# --------------------------------------------------------------------------
if __name__ == "__main__":
    key = jax.random.PRNGKey(0)
    batch = 2
    N = 8        # detections per image (Ns == Nt)
    C = 16       # number of classes (logit dim)

    student_outputs, teacher_outputs = [], []
    for b in range(batch):
        key, k1, k2, k3, k4, k5 = jax.random.split(key, 6)
        # teacher boxes: well-formed (x1<x2, y1<y2) in a 0..100 canvas
        xy = jax.random.uniform(k1, (N, 2), minval=0.0, maxval=60.0)
        wh = jax.random.uniform(k2, (N, 2), minval=10.0, maxval=30.0)
        t_boxes = jnp.concatenate([xy, xy + wh], axis=1).astype(jnp.float32)
        # student boxes: teacher + small jitter so IoU > threshold for matching
        s_boxes = t_boxes + jax.random.normal(k3, (N, 4)) * 0.5

        t_scores = jax.random.normal(k4, (N, C), dtype=jnp.float32)
        s_scores = t_scores + jax.random.normal(k5, (N, C)) * 0.3
        labels = jnp.argmax(t_scores, axis=1).astype(jnp.int32)

        teacher_outputs.append({'boxes': t_boxes, 'scores': t_scores, 'labels': labels})
        student_outputs.append({'boxes': s_boxes, 'scores': s_scores, 'labels': labels})

    loss = knowledge_distillation_loss(student_outputs, teacher_outputs)
    jax.block_until_ready(loss)
    assert jnp.isfinite(loss), "loss is not finite"
    print("KERNEL_OK")
</pallas_src>

<mosaic_0001>
module attributes {stable_mosaic.version = 11 : i64} {
  func.func @_iou_kernel(%arg0: i32, %arg1: memref<2x8x4xf32, #tpu.memory_space<vmem>>, %arg2: memref<2x4x128xf32, #tpu.memory_space<vmem>>, %arg3: memref<2x8x128xf32, #tpu.memory_space<vmem>>) attributes {dimension_semantics = [#tpu.dimension_semantics<arbitrary>], iteration_bounds = array<i64: 1>, scalar_prefetch = 0 : i64, scratch_operands = 0 : i64, tpu.core_type = #tpu.core_type<tc>, window_params = [{pipeline_mode = #tpu.pipeline_mode<synchronous>, transform_indices = @transform_0, window_bounds = array<i64: 2, 8, 4>}, {pipeline_mode = #tpu.pipeline_mode<synchronous>, transform_indices = @transform_1, window_bounds = array<i64: 2, 4, 128>}, {pipeline_mode = #tpu.pipeline_mode<synchronous>, transform_indices = @transform_2, window_bounds = array<i64: 2, 8, 128>}]} {
    %c0 = arith.constant 0 : index
    %c0_0 = arith.constant 0 : index
    %c0_1 = arith.constant 0 : index
    %0 = vector.load %arg1[%c0, %c0_0, %c0_1] : memref<2x8x4xf32, #tpu.memory_space<vmem>>, vector<2x8x4xf32>
    %c0_2 = arith.constant 0 : index
    %c0_3 = arith.constant 0 : index
    %c0_4 = arith.constant 0 : index
    %1 = vector.load %arg2[%c0_2, %c0_3, %c0_4] : memref<2x4x128xf32, #tpu.memory_space<vmem>>, vector<2x4x128xf32>
    %2 = vector.extract_strided_slice %0 {offsets = [0, 0, 0], sizes = [2, 8, 1], strides = [1, 1, 1]} : vector<2x8x4xf32> to vector<2x8x1xf32>
    %3 = vector.extract_strided_slice %0 {offsets = [0, 0, 1], sizes = [2, 8, 1], strides = [1, 1, 1]} : vector<2x8x4xf32> to vector<2x8x1xf32>
    %4 = vector.extract_strided_slice %0 {offsets = [0, 0, 2], sizes = [2, 8, 1], strides = [1, 1, 1]} : vector<2x8x4xf32> to vector<2x8x1xf32>
    %5 = vector.extract_strided_slice %0 {offsets = [0, 0, 3], sizes = [2, 8, 1], strides = [1, 1, 1]} : vector<2x8x4xf32> to vector<2x8x1xf32>
    %6 = vector.extract_strided_slice %1 {offsets = [0, 0, 0], sizes = [2, 1, 128], strides = [1, 1, 1]} : vector<2x4x128xf32> to vector<2x1x128xf32>
    %7 = vector.extract_strided_slice %1 {offsets = [0, 1, 0], sizes = [2, 1, 128], strides = [1, 1, 1]} : vector<2x4x128xf32> to vector<2x1x128xf32>
    %8 = vector.extract_strided_slice %1 {offsets = [0, 2, 0], sizes = [2, 1, 128], strides = [1, 1, 1]} : vector<2x4x128xf32> to vector<2x1x128xf32>
    %9 = vector.extract_strided_slice %1 {offsets = [0, 3, 0], sizes = [2, 1, 128], strides = [1, 1, 1]} : vector<2x4x128xf32> to vector<2x1x128xf32>
    %10 = arith.subf %4, %2 : vector<2x8x1xf32>
    %11 = arith.subf %5, %3 : vector<2x8x1xf32>
    %12 = arith.mulf %10, %11 : vector<2x8x1xf32>
    %13 = arith.subf %8, %6 : vector<2x1x128xf32>
    %14 = arith.subf %9, %7 : vector<2x1x128xf32>
    %15 = arith.mulf %13, %14 : vector<2x1x128xf32>
    %16 = vector.broadcast %4 : vector<2x8x1xf32> to vector<2x8x128xf32>
    %17 = vector.broadcast %8 : vector<2x1x128xf32> to vector<2x8x128xf32>
    %18 = arith.minimumf %16, %17 : vector<2x8x128xf32>
    %19 = vector.broadcast %2 : vector<2x8x1xf32> to vector<2x8x128xf32>
    %20 = vector.broadcast %6 : vector<2x1x128xf32> to vector<2x8x128xf32>
    %21 = arith.maximumf %19, %20 : vector<2x8x128xf32>
    %22 = arith.subf %18, %21 : vector<2x8x128xf32>
    %cst = arith.constant 0.000000e+00 : f32
    %23 = vector.broadcast %cst : f32 to vector<2x8x128xf32>
    %24 = arith.maximumf %22, %23 : vector<2x8x128xf32>
    %25 = vector.broadcast %5 : vector<2x8x1xf32> to vector<2x8x128xf32>
    %26 = vector.broadcast %9 : vector<2x1x128xf32> to vector<2x8x128xf32>
    %27 = arith.minimumf %25, %26 : vector<2x8x128xf32>
    %28 = vector.broadcast %3 : vector<2x8x1xf32> to vector<2x8x128xf32>
    %29 = vector.broadcast %7 : vector<2x1x128xf32> to vector<2x8x128xf32>
    %30 = arith.maximumf %28, %29 : vector<2x8x128xf32>
    %31 = arith.subf %27, %30 : vector<2x8x128xf32>
    %cst_5 = arith.constant 0.000000e+00 : f32
    %32 = vector.broadcast %cst_5 : f32 to vector<2x8x128xf32>
    %33 = arith.maximumf %31, %32 : vector<2x8x128xf32>
    %34 = arith.mulf %24, %33 : vector<2x8x128xf32>
    %35 = vector.broadcast %12 : vector<2x8x1xf32> to vector<2x8x128xf32>
    %36 = vector.broadcast %15 : vector<2x1x128xf32> to vector<2x8x128xf32>
    %37 = arith.addf %35, %36 : vector<2x8x128xf32>
    %38 = arith.subf %37, %34 : vector<2x8x128xf32>
    %39 = arith.divf %34, %38 : vector<2x8x128xf32>
    %c0_6 = arith.constant 0 : index
    %c0_7 = arith.constant 0 : index
    %c0_8 = arith.constant 0 : index
    %40 = vector.load %arg3[%c0_6, %c0_7, %c0_8] : memref<2x8x128xf32, #tpu.memory_space<vmem>>, vector<2x8x128xf32>
    tpu.vector_store %arg3[%c0_6, %c0_7, %c0_8], %39 {strides = array<i32>} : memref<2x8x128xf32, #tpu.memory_space<vmem>>, vector<2x8x128xf32>,
    return
  }
  func.func @transform_0(%arg0: i32) -> (i32, i32, i32) {
    %c0_i32 = arith.constant 0 : i32
    %c0_i32_0 = arith.constant 0 : i32
    %c0_i32_1 = arith.constant 0 : i32
    %c0_i32_2 = arith.constant 0 : i32
    return %c0_i32, %c0_i32_0, %c0_i32_1 : i32, i32, i32
  }
  func.func @transform_1(%arg0: i32) -> (i32, i32, i32) {
    %c0_i32 = arith.constant 0 : i32
    %c0_i32_0 = arith.constant 0 : i32
    %c0_i32_1 = arith.constant 0 : i32
    %c0_i32_2 = arith.constant 0 : i32
    return %c0_i32, %c0_i32_0, %c0_i32_1 : i32, i32, i32
  }
  func.func @transform_2(%arg0: i32) -> (i32, i32, i32) {
    %c0_i32 = arith.constant 0 : i32
    %c0_i32_0 = arith.constant 0 : i32
    %c0_i32_1 = arith.constant 0 : i32
    %c0_i32_2 = arith.constant 0 : i32
    return %c0_i32, %c0_i32_0, %c0_i32_1 : i32, i32, i32
  }
}

</mosaic_0001>

<bundles_post_ra>
// kernel: compute_iou_batched.1
= control target key start
LH: loop header
LB: loop body
LE: loop exit
PB: predicated region body
PF: predicated region fallthrough
CT: control target
= control target key end

     0   :  { %s224_s11 = smov 2   ;;  %v225_v1 = vmov 2   ;;  %s272_s0 = inlined_call_operand.vmem [shape: f32[2,8,4], index: 0, kind: input, shape index: {}]   ;;  %s273_s1 = inlined_call_operand.vmem [shape: f32[2,4,128], index: 1, kind: input, shape index: {}]   ;;  %s274_s2 = inlined_call_operand.hbm [shape: f32[2,8,128], index: 2, kind: output, shape index: {}]  }
   0x1   :  { %v12_v0 = vld [vmem:[%s272_s0] sm:$0xff]  ;;  %188 = vset.pattern.permute.xlu1 %v225_v1 }
   0x2   :  { %18 = vrot.lane.b32.xlu0 %v12_v0, %s224_s11 }
   0x3   :  { %7 = vsyncpa [#allocation3], 0  ;;  %v13_v2 = vld [vmem:[%s272_s0 + $0x8] sm:$0xff]  ;;  %187 = vset.pattern.permute.xlu0 %v225_v1  ;;  %v226_v3 = vmov 0   ;;  %v227_v4 = vmov 1   ;;  %s228_s14 = smov 127   ;;  %v60_v16 = vlaneseq }
   0x4   :  { %v229_v9 = vmov 3   ;;  %v14_v20 = vld [vmem:[%s273_s1] sm:$0xf]  ;;  %v15_v24 = vld [vmem:[%s273_s1 + $0x4] sm:$0xf]  ;;  %s230_s1 = smov [#allocation2]  }
   0x5   :  { %v61_v18 = vshrl.u32 %v60_v16, 7  ;;  %v38_v22 = vrot.slane %v14_v20, 6  ;;  %v39_v31 = vrot.slane %v15_v24, 6  ;;  %s167_s18 = sshll.u32 %s230_s1, 4  ;;  %s168_s18 = int_to_ptr.vmem [resolvable:$true] %s167_s18 }
   0x6   :  { %20 = vrot.lane.b32.xlu0 %v13_v2, %s224_s11  ;;  %s200_s19 = scalar_lea.vmem %s168_s18, 256  ;;  %p205_p1 = scmp.lt.s32.totalorder %s168_s18, %s168_s18 }
   0x7   :  { %v62_v23 = vsub.s32 2, %v61_v18  ;;  %v80_v25 = vsub.s32 0, %v61_v18  ;;  %v102_v26 = vsub.s32 3, %v61_v18  ;;  %v120_v27 = vsub.s32 1, %v61_v18  ;;  %p201_p0 = scmp.ne.s32.totalorder %s168_s18, %s200_s19  ;;  %p206_p2 = scmp.lt.s32.totalorder %s200_s19, %s200_s19 }
   0x8   :  { %v42_v30 = vsub.f32 %v14_v20, %v38_v22  ;;  %v43_v41 = vsub.f32 %v15_v24, %v39_v31 }
   0x9   :  { %v63_v29 = vrot.slane %v14_v20, %v62_v23  ;;  %v81_v32 = vrot.slane %v14_v20, %v80_v25  ;;  %v103_v33 = vrot.slane %v14_v20, %v102_v26  ;;  %v121_v34 = vrot.slane %v14_v20, %v120_v27  ;;  %p207_p3 = por %p206_p2, %p205_p1 }
   0xa   :  { %53 = vperm.xlu0 %187, %v12_v0   ;;  %v67_v36 = vrot.slane %v15_v24, %v62_v23  ;;  %v107_v37 = vrot.slane %v15_v24, %v102_v26  ;;  %v85_v39 = vrot.slane %v15_v24, %v80_v25  ;;  %v46_v40 = vrot.slane %v42_v30, 1 }
   0xb   :  { %v125_v44 = vrot.slane %v15_v24, %v120_v27  ;;  %v47_v50 = vrot.slane %v43_v41, 1  ;;  %p208_p4 = pnand %p207_p3, %p201_p0 }
   0xc   :  { %v50_v49 = vmul.f32 %v46_v40, %v42_v30 }
   0xd   :  { %v51_v56 = vmul.f32 %v47_v50, %v43_v41 }
   0xe   :  { %190 = vset.pattern.permute.xlu0 %v226_v3  ;;  %v147_v55 = vrot.slane %v50_v49, %v62_v23 }
   0xf   :  { %75 = vperm.xlu0 %190, %v13_v2   ;;  %v151_v62 = vrot.slane %v51_v56, %v62_v23 }
  0x13   :  { %192 = vset.pattern.permute.xlu0 %v227_v4 }
  0x14   :  { %111 = vperm.xlu0 %192, %v12_v0  }
  0x18   :  { %195 = vset.pattern.permute.xlu0 %v225_v1 }
  0x74   :  { %v19_v5 = vpop.permute.xlu0 %18 }
  0x75   :  { %v24_v6 = vsub.f32 %v12_v0, %v19_v5 }
  0x77   :  { %28 = vrot.lane.b32.xlu1 %v24_v6, %s228_s14 }
  0x78   :  { %v21_v7 = vpop.permute.xlu0 %20 }
  0x79   :  { %v25_v8 = vsub.f32 %v13_v2, %v21_v7 }
  0x7b   :  { %30 = vrot.lane.b32.xlu1 %v25_v8, %s228_s14 }
  0x7f   :  { %57 = vperm.xlu1 %188, %v13_v2  }
  0x83   :  { %189 = vset.pattern.permute.xlu1 %v226_v3 }
  0x84   :  { %71 = vperm.xlu1 %189, %v12_v0  }
  0x88   :  { %191 = vset.pattern.permute.xlu1 %v229_v9 }
  0x89   :  { %93 = vperm.xlu1 %191, %v12_v0   ;;  %v54_v17 = vpop.permute.xlu0 %53 }
  0x8a   :  { %v68_v38 = vmin.f32 %v54_v17, %v63_v29 }
  0x8d   :  { %97 = vperm.xlu1 %191, %v13_v2  }
  0x8e   :  { %v76_v21 = vpop.permute.xlu0 %75 }
  0x8f   :  { %v87_v48 = vmax.f32 %v76_v21, %v85_v39 }
  0x91   :  { %193 = vset.pattern.permute.xlu1 %v227_v4 }
  0x92   :  { %115 = vperm.xlu1 %193, %v13_v2  }
  0x93   :  { %v112_v35 = vpop.permute.xlu0 %111 }
  0x94   :  { %v126_v45 = vmax.f32 %v112_v35, %v121_v34 }
  0x96   :  { %194 = vset.pattern.permute.xlu1 %v225_v1 }
  0xe9   :  { %v29_v10 = vpop.permute.xlu1 %28 }
  0xea   :  { %v34_v11 = vmul.f32 %v29_v10, %v24_v6 }
  0xec   :  { %136 = vperm.xlu1 %194, %v34_v11  }
  0xed   :  { %v31_v12 = vpop.permute.xlu1 %30 }
  0xee   :  { %v35_v13 = vmul.f32 %v31_v12, %v25_v8 }
  0xf0   :  { %141 = vperm.xlu0 %195, %v35_v13  }
  0xfe   :  { %v58_v14 = vpop.permute.xlu1 %57 }
  0xff   :  { %v69_v47 = vmin.f32 %v58_v14, %v67_v36 }
 0x101   :  { %v89_v59 = vsub.f32 %v69_v47, %v87_v48 }
 0x103   :  { %v72_v15 = vpop.permute.xlu1 %71  ;;  %v91_v0 = vmax.f32 %v89_v59, 0.0 }
 0x104   :  { %v86_v42 = vmax.f32 %v72_v15, %v81_v32 }
 0x106   :  { %v88_v52 = vsub.f32 %v68_v38, %v86_v42 }
 0x108   :  { %v94_v19 = vpop.permute.xlu1 %93  ;;  %v90_v57 = vmax.f32 %v88_v52, 0.0 }
 0x109   :  { %v108_v43 = vmin.f32 %v94_v19, %v103_v33 }
 0x10b   :  { %v128_v54 = vsub.f32 %v108_v43, %v126_v45 }
 0x10c   :  { %v98_v28 = vpop.permute.xlu1 %97 }
 0x10d   :  { %v109_v51 = vmin.f32 %v98_v28, %v107_v37  ;;  %v130_v60 = vmax.f32 %v128_v54, 0.0 }
 0x10f   :  { %v132_v1 = vmul.f32 %v130_v60, %v90_v57 }
 0x111   :  { %v116_v46 = vpop.permute.xlu1 %115 }
 0x112   :  { %v127_v53 = vmax.f32 %v116_v46, %v125_v44 }
 0x114   :  { %v129_v58 = vsub.f32 %v109_v51, %v127_v53 }
 0x116   :  { %v131_v63 = vmax.f32 %v129_v58, 0.0 }
 0x118   :  { %v133_v5 = vmul.f32 %v131_v63, %v91_v0 }
 0x16b   :  { %v137_v61 = vpop.permute.xlu1 %136 }
 0x16c   :  { %v152_v2 = vadd.f32 %v147_v55, %v137_v61 }
 0x16e   :  { %v154_v3 = vsub.f32 %v152_v2, %v132_v1 }
 0x16f   :  { %v142_v4 = vpop.permute.xlu0 %141 }
 0x170   :  { %196 = vrcp.f32 %v154_v3  ;;  %v153_v6 = vadd.f32 %v151_v62, %v142_v4 }
 0x172   :  { %v155_v7 = vsub.f32 %v153_v6, %v133_v5 }
 0x174   :  { %198 = vrcp.f32 %v155_v7 }
 0x17a   :  { %v197_v8 = vpop.eup %196 }
 0x17b   :  { %v157_v9 = vmul.f32 %v197_v8, %v132_v1 }
 0x17d   :  { %160 = vst [vmem:[#allocation2] sm:$0xff] %v157_v9 }
 0x17e   :  { %v199_v10 = vpop.eup %198 }
 0x17f   :  { %v159_v11 = vmul.f32 %v199_v10, %v133_v5 }
 0x181   :  { %161 = vst [vmem:[#allocation2 + $0x8] sm:$0xff] %v159_v11 }
 0x182   :  { %211 = shalt.err (!%p208_p4)
}
 0x183   :  { %s212_s22 = scalar_lea.hbm %s274_s2, 256 }
 0x184   :  { %p213_p5 = scmp.ne.s32.totalorder %s274_s2, %s212_s22  ;;  %p216_p6 = scmp.lt.u32.totalorder %s212_s22, %s274_s2 }
 0x186   :  { %p218_p7 = pnand %p216_p6, %p213_p5 }
 0x188   :  { %221 = shalt.err (!%p218_p7)
}
 0x189   :  { %s231_s27 = smov 128   ;;  %s232_s28 = smov 8  }
 0x18a   :  { %173 = dma.vmem_to_hbm [thread:$0]  %s168_s18, 256, %s274_s2, [#allocation3], %s231_s27, %s231_s27, %s232_s28  }
 0x18b   :  { %222 = dma.done.wait [#allocation3], 256  }
 0x18c   :  { %223 = vsyncadd [#allocation3], 4294967040 }
 0x18d   :  { %177 = vsyncpa [#allocation3], 1 }

</bundles_post_ra>
